<compile_context>
chip_gen: v5e
topology: v5e:2x2
jax: 0.10.0
libtpu: 0.0.40
codegen_flags: <defaults>
</compile_context>

<pallas_src>
import functools

import jax
import jax.numpy as jnp
from jax.experimental import pallas as pl
from jax.experimental.pallas import tpu as pltpu

_LANE = 128
_SUBLANE = 8


def _round_up(n, m):
    return ((n + m - 1) // m) * m


def _decoder_kernel(x_ref, w_ref, b_ref, o_ref, act_ref):
    """One grid step = (batch tile i, layer l).

    x_ref  : (Bt, Dp)  f32   padded input activations (consumed at layer 0)
    w_ref  : (Dp, Dp)  bf16  pre-transposed, zero-padded weight of layer l
    b_ref  : (1, Dp)   f32   zero-padded bias of layer l
    o_ref  : (Bt, Dp)  f32   output tile (VMEM-resident across the layer axis)
    act_ref: (Bt, Dp)  f32   activation carry, never touches HBM
    """
    layer = pl.program_id(1)

    @pl.when(layer == 0)
    def _():
        act_ref[...] = x_ref[...].astype(jnp.float32)

    # TODO(synk): Dropout is identity (eval mode); training-mode dropout would
    # need pltpu.prng_seed / prng_random_bits here.
    y = jnp.dot(act_ref[...].astype(jnp.bfloat16), w_ref[...],
                preferred_element_type=jnp.float32)
    y = jnp.maximum(y + b_ref[...], 0.0)
    act_ref[...] = y

    @pl.when(layer == pl.num_programs(1) - 1)
    def _():
        o_ref[...] = y.astype(o_ref.dtype)


def init_decoder_params(key, hidden):
    """nn.Linear-shaped params (W:(out,in), b:(out,)) in application order."""
    params = []
    for i in range(len(hidden) - 1, 0, -1):
        key, kw, kb = jax.random.split(key, 3)
        fan_in = hidden[i]
        bound = 1.0 / jnp.sqrt(fan_in)
        w = jax.random.uniform(kw, (hidden[i - 1], hidden[i]),
                               minval=-bound, maxval=bound, dtype=jnp.float32)
        b = jax.random.uniform(kb, (hidden[i - 1],),
                               minval=-bound, maxval=bound, dtype=jnp.float32)
        params.append((w, b))
    return params


def prepare_decoder_params(params):
    """Pre-transpose, zero-pad to (D_pad, D_pad), cast to bf16, stack. Done once."""
    dims = [params[0][0].shape[1]] + [w.shape[0] for w, _ in params]
    d_pad = _round_up(max(dims), _LANE)
    ws, bs = [], []
    for w, b in params:
        d_out, d_in = w.shape
        wt = jnp.zeros((d_pad, d_pad), jnp.bfloat16)
        wt = wt.at[:d_in, :d_out].set(w.T.astype(jnp.bfloat16))
        bb = jnp.zeros((1, d_pad), jnp.float32).at[0, :d_out].set(b)
        ws.append(wt)
        bs.append(bb)
    w_stack = jnp.stack(ws)                    # (L, D_pad, D_pad) bf16
    b_stack = jnp.stack(bs)                    # (L, 1, D_pad)     f32
    return w_stack, b_stack, dims[0], dims[-1], d_pad


@functools.partial(jax.jit, static_argnames=("d_out", "batch_tile"))
def decoder_forward(x, w_stack, b_stack, *, d_out, batch_tile=512):
    batch, d_in = x.shape
    num_layers, d_pad, _ = w_stack.shape

    b_tile = min(batch_tile, _round_up(batch, _SUBLANE))
    b_pad = _round_up(batch, b_tile)

    xp = jnp.zeros((b_pad, d_pad), jnp.float32)
    xp = xp.at[:batch, :d_in].set(x.astype(jnp.float32))

    grid = (b_pad // b_tile, num_layers)

    out = pl.pallas_call(
        _decoder_kernel,
        out_shape=jax.ShapeDtypeStruct((b_pad, d_pad), jnp.float32),
        grid_spec=pltpu.PrefetchScalarGridSpec(
            num_scalar_prefetch=0,
            grid=grid,
            in_specs=[
                pl.BlockSpec((b_tile, d_pad), lambda i, l: (i, 0)),
                pl.BlockSpec((None, d_pad, d_pad), lambda i, l: (l, 0, 0)),
                pl.BlockSpec((None, 1, d_pad), lambda i, l: (l, 0, 0)),
            ],
            out_specs=pl.BlockSpec((b_tile, d_pad), lambda i, l: (i, 0)),
            scratch_shapes=[pltpu.VMEM((b_tile, d_pad), jnp.float32)],
        ),
        compiler_params=pltpu.CompilerParams(
            dimension_semantics=("parallel", "arbitrary"),
            vmem_limit_bytes=64 * 1024 * 1024,
        ),
    )(xp, w_stack, b_stack)

    return out[:batch, :d_out]


def decoder_ref_f32(x, params):
    """Pure-JAX f32 reference (matches the PyTorch module in eval mode)."""
    for w, b in params:
        x = jnp.maximum(x @ w.T + b, 0.0)
    return x


def decoder_ref_bf16(x, params):
    """Reference matching the kernel's bf16-operand / f32-accumulate matmul."""
    for w, b in params:
        y = jnp.dot(x.astype(jnp.bfloat16), w.T.astype(jnp.bfloat16),
                    preferred_element_type=jnp.float32)
        x = jnp.maximum(y + b, 0.0)
    return x


if __name__ == "__main__":
    key = jax.random.PRNGKey(0)
    hidden = [32, 64, 32]     # Decoder_t(hidden): maps hidden[-1] -> hidden[0]
    batch = 8

    key, kx = jax.random.split(key)
    x = jax.random.normal(kx, (batch, hidden[-1]), dtype=jnp.float32)

    params = init_decoder_params(key, hidden)
    w_stack, b_stack, d_in, d_out, d_pad = prepare_decoder_params(params)
    assert d_in == hidden[-1] and d_out == hidden[0]

    out = decoder_forward(x, w_stack, b_stack, d_out=d_out)
    out = jax.block_until_ready(out)

    assert out.shape == (batch, hidden[0])
    ref_bf16 = decoder_ref_bf16(x, params)
    ref_f32 = decoder_ref_f32(x, params)
    assert jnp.allclose(out, ref_bf16, atol=1e-4, rtol=1e-4), \
        "mismatch vs bf16-matmul reference"
    assert jnp.allclose(out, ref_f32, atol=5e-2, rtol=5e-2), \
        "mismatch vs f32 reference"

    print("KERNEL_OK")
</pallas_src>

<mosaic_0001>
module attributes {stable_mosaic.version = 11 : i64} {
  func.func @_decoder_kernel(%arg0: i32, %arg1: i32, %arg2: memref<8x128xf32, #tpu.memory_space<vmem>>, %arg3: memref<1x128x128xbf16, #tpu.memory_space<vmem>>, %arg4: memref<1x1x128xf32, #tpu.memory_space<vmem>>, %arg5: memref<8x128xf32, #tpu.memory_space<vmem>>, %arg6: memref<8x128xf32, #tpu.memory_space<vmem>>) attributes {dimension_semantics = [#tpu.dimension_semantics<parallel>, #tpu.dimension_semantics<arbitrary>], iteration_bounds = array<i64: 1, 2>, scalar_prefetch = 0 : i64, scratch_operands = 1 : i64, tpu.core_type = #tpu.core_type<tc>, window_params = [{transform_indices = @transform_0, window_bounds = array<i64: 8, 128>}, {transform_indices = @transform_1, window_bounds = array<i64: 1, 128, 128>}, {transform_indices = @transform_2, window_bounds = array<i64: 1, 1, 128>}, {transform_indices = @transform_3, window_bounds = array<i64: 8, 128>}]} {
    %c0_i32 = arith.constant 0 : i32
    %0 = arith.cmpi eq, %arg1, %c0_i32 : i32
    %1 = arith.extui %0 : i1 to i32
    %c0_i32_0 = arith.constant 0 : i32
    %2 = arith.cmpi ne, %1, %c0_i32_0 : i32
    scf.if %2 {
      %c0_12 = arith.constant 0 : index
      %c0_13 = arith.constant 0 : index
      %18 = vector.load %arg2[%c0_12, %c0_13] : memref<8x128xf32, #tpu.memory_space<vmem>>, vector<8x128xf32>
      %c0_14 = arith.constant 0 : index
      %c0_15 = arith.constant 0 : index
      %19 = vector.load %arg6[%c0_14, %c0_15] : memref<8x128xf32, #tpu.memory_space<vmem>>, vector<8x128xf32>
      tpu.vector_store %arg6[%c0_14, %c0_15], %18 {strides = array<i32>} : memref<8x128xf32, #tpu.memory_space<vmem>>, vector<8x128xf32>,
    } else {
    }
    %c0 = arith.constant 0 : index
    %c0_1 = arith.constant 0 : index
    %3 = vector.load %arg6[%c0, %c0_1] : memref<8x128xf32, #tpu.memory_space<vmem>>, vector<8x128xf32>
    %4 = arith.truncf %3 : vector<8x128xf32> to vector<8x128xbf16>
    %c0_2 = arith.constant 0 : index
    %c0_3 = arith.constant 0 : index
    %c0_4 = arith.constant 0 : index
    %5 = vector.load %arg3[%c0_2, %c0_3, %c0_4] : memref<1x128x128xbf16, #tpu.memory_space<vmem>>, vector<1x128x128xbf16>
    %6 = vector.shape_cast %5 : vector<1x128x128xbf16> to vector<128x128xbf16>
    %cst = arith.constant dense<0.000000e+00> : vector<8x128xf32>
    %7 = tpu.matmul %4, %6, %cst {dimension_numbers = #tpu.dot_dimension_numbers<[1], [0], [0], [1], [0, 0, 1, 1], [], []>} : vector<8x128xbf16>, vector<128x128xbf16>, vector<8x128xf32> -> vector<8x128xf32>
    %c0_5 = arith.constant 0 : index
    %c0_6 = arith.constant 0 : index
    %c0_7 = arith.constant 0 : index
    %8 = vector.load %arg4[%c0_5, %c0_6, %c0_7] : memref<1x1x128xf32, #tpu.memory_space<vmem>>, vector<1x1x128xf32>
    %9 = vector.shape_cast %8 : vector<1x1x128xf32> to vector<1x128xf32>
    %10 = vector.broadcast %9 : vector<1x128xf32> to vector<8x128xf32>
    %11 = arith.addf %7, %10 : vector<8x128xf32>
    %cst_8 = arith.constant 0.000000e+00 : f32
    %12 = vector.broadcast %cst_8 : f32 to vector<8x128xf32>
    %13 = arith.maximumf %11, %12 : vector<8x128xf32>
    %c0_9 = arith.constant 0 : index
    %c0_10 = arith.constant 0 : index
    %14 = vector.load %arg6[%c0_9, %c0_10] : memref<8x128xf32, #tpu.memory_space<vmem>>, vector<8x128xf32>
    tpu.vector_store %arg6[%c0_9, %c0_10], %13 {strides = array<i32>} : memref<8x128xf32, #tpu.memory_space<vmem>>, vector<8x128xf32>,
    %c1_i32 = arith.constant 1 : i32
    %15 = arith.cmpi eq, %arg1, %c1_i32 : i32
    %16 = arith.extui %15 : i1 to i32
    %c0_i32_11 = arith.constant 0 : i32
    %17 = arith.cmpi ne, %16, %c0_i32_11 : i32
    scf.if %17 {
      %c0_12 = arith.constant 0 : index
      %c0_13 = arith.constant 0 : index
      %18 = vector.load %arg5[%c0_12, %c0_13] : memref<8x128xf32, #tpu.memory_space<vmem>>, vector<8x128xf32>
      tpu.vector_store %arg5[%c0_12, %c0_13], %13 {strides = array<i32>} : memref<8x128xf32, #tpu.memory_space<vmem>>, vector<8x128xf32>,
    } else {
    }
    return
  }
  func.func @transform_0(%arg0: i32, %arg1: i32) -> (i32, i32) {
    %c0_i32 = arith.constant 0 : i32
    %c0_i32_0 = arith.constant 0 : i32
    return %arg0, %c0_i32 : i32, i32
  }
  func.func @transform_1(%arg0: i32, %arg1: i32) -> (i32, i32, i32) {
    %c0_i32 = arith.constant 0 : i32
    %c0_i32_0 = arith.constant 0 : i32
    %c0_i32_1 = arith.constant 0 : i32
    return %arg1, %c0_i32, %c0_i32_0 : i32, i32, i32
  }
  func.func @transform_2(%arg0: i32, %arg1: i32) -> (i32, i32, i32) {
    %c0_i32 = arith.constant 0 : i32
    %c0_i32_0 = arith.constant 0 : i32
    %c0_i32_1 = arith.constant 0 : i32
    return %arg1, %c0_i32, %c0_i32_0 : i32, i32, i32
  }
  func.func @transform_3(%arg0: i32, %arg1: i32) -> (i32, i32) {
    %c0_i32 = arith.constant 0 : i32
    %c0_i32_0 = arith.constant 0 : i32
    return %arg0, %c0_i32 : i32, i32
  }
}

</mosaic_0001>

<bundles_post_ra>
// kernel: decoder_forward.1
= control target key start
LH: loop header
LB: loop body
LE: loop exit
PB: predicated region body
PF: predicated region fallthrough
CT: control target
= control target key end

     0   :  { %8 = vsyncpa [#allocation4], 0  ;;  %s777_s0 = inlined_call_operand.vmem [shape: f32[8,128], index: 0, kind: input, shape index: {}]   ;;  %s778_s1 = inlined_call_operand.hbm [shape: bf16[2,128,128], index: 1, kind: input, shape index: {}]   ;;  %s779_s2 = inlined_call_operand.vmem [shape: f32[2,1,128], index: 2, kind: input, shape index: {}]   ;;  %s780_s3 = inlined_call_operand.hbm [shape: f32[8,128], index: 3, kind: output, shape index: {}]  }
   0x1   :  { %10 = vsyncpa [#allocation4 + $0x1], 0 }
   0x2   :  { %11 = vsyncpa [#allocation5], 0  ;;  %s677_s12 = smov 0   ;;  %s679_s13 = smov 0  }
   0x3   :  { %s681_s14 = smov 0   ;;  %s683_s15 = smov 0  }
   0x4   :  { %s685_s16 = smov 0   ;;  %s687_s17 = smov 0  }
   0x5 LB: > { %s419_s18 = sadd.s32 4294967295, %s652_s17   ;;  %s26_s19 = sadd.s32 1, %s648_s16  ;;  %s652_s17 = sphi %s687_s17, %s17_s17   ;;  %s648_s16 = sphi %s685_s16, %s787_s16   ;;  %s644_s15 = sphi %s683_s15, %s786_s15   ;;  %s640_s14 = sphi %s681_s14, %s785_s14   ;;  %s636_s13 = sphi %s679_s13, %s784_s13   ;;  %s632_s12 = sphi %s677_s12, %s783_s12  }
   0x6   : > { %p27_p0 = scmp.ge.s32.totalorder %s26_s19, 2  ;;  %s62_s20 = sadd.s32 1, %s640_s14 }
   0x7   : > { %p69_p1 = scmp.ne.s32.totalorder %s640_s14, %s636_s13  ;;  %p70_p2 = scmp.eq.s32.totalorder %s652_s17, 0 }
   0x8   : > { %s789_s19 = smov (%p27_p0, %s26_s19), 0  ;;  %p75_p4 = scmp.ne.s32.totalorder %s636_s13, %s632_s12 }
   0x9   : > { %p713_p3 = por %p70_p2, %p69_p1  ;;  %s59_s22 = ssub.s32 %s648_s16, %s789_s19 }
   0xa   : > { %p76_p5 = scmp.eq.s32.totalorder %s419_s18, 0  ;;  %p60_p6 = scmp.eq.s32.totalorder %s59_s22, 0 }
   0xb   : > { %p485_p8 = scmp.lt.s32.totalorder %s652_s17, 2  ;;  %s158_s25 = sand.u32 1, %s640_s14  }
   0xc   : > { %p722_p7 = por %p76_p5, %p75_p4  ;;  %s466_s26 = sshll.u32 %s648_s16, 6 }
   0xd   : > { %s728_s24 = scalar_select %p60_p6, %s640_s14, %s62_s20  }
   0xe   : > { %s423_s27 = sshll.u32 %s158_s25, 6  ;;  %s167_s30 = scalar_lea.hbm %s778_s1, %s466_s26 }
   0xf   : > { %s168_s4 = sshll.u32 %s167_s30, 4  ;;  %s162_s5 = scalar_lea.vmem [#allocation3], %s423_s27  ;;  %s169_s4 = int_to_ptr.hbm [resolvable:$true] %s168_s4 }
  0x10   : > { %s170_s6 = sshll.u32 %s162_s5, 4  ;;  %p482_p9 = pnand %p485_p8, %p713_p3  ;;  %s171_s6 = int_to_ptr.vmem [resolvable:$true] %s170_s6 }
  0x11   : > { %p426_p10 = scmp.ge.s32.totalorder %s652_s17, 1  ;;  %p184_p11 = scmp.lt.s32.totalorder %s652_s17, 3 }
  0x12   : > { %s159_s7 = scalar_lea.sflag [#allocation4], %s158_s25  ;;  %s654_s8 = smov 64  }
  0x13   : > { %s655_s9 = smov 4   ;;  %p185_p12 = pnand %p426_p10, %p184_p11 }
  0x14   : > { %484 = dma.hbm_to_vmem [thread:$0]  (!%p482_p9), %s169_s4, 1024, %s171_s6, %s159_s7, %s654_s8, %s654_s8, %s655_s9  }
  0x15   : > { %188 = sbr.rel (%p185_p12) target bundleno = 210 (0xd2), region = 32  ;;  %s190_s10 = sand.u32 (!%p185_p12), 1, %s636_s13  }
  0x16   : > { %s427_s11 = sshll.u32 (!%p185_p12), %s190_s10, 6  ;;  %s191_s12 = scalar_lea.sflag (!%p185_p12), [#allocation4], %s190_s10 }
  0x17   : > { %s194_s20 = scalar_lea.vmem (!%p185_p12), [#allocation3], %s427_s11 }
  0x1a   : > { %623 = dma.done.wait (%p722_p7), %s191_s12, 1024  }
  0x1b   : > { %625 = vsyncadd (%p722_p7), %s191_s12, 4294966272  ;;  %p224_p13 = scmp.lt.s32.totalorder %s644_s15, 1  ;;  %p428_p0 = scmp.ne.s32.totalorder %s644_s15, 0 }
  0x1d   : > { %s225_s21 = scalar_select %p224_p13, %s644_s15, 1 }
  0x1e   : > { %230 = sbr.rel (%p428_p0) target bundleno = 37 (0x25), region = 40 }
  0x1f   : > { %s226_s26 = scalar_lea.vmem %s779_s2, %s225_s21 }
  0x23   : > { %v231_v0 = vld [vmem:[%s777_s0] sm:$0xff] }
  0x24   : > { %232 = vst [vmem:[#allocation2] sm:$0xff] %v231_v0 }
  0x25 PF: > { %v474_v1 = vld [vmem:[%s194_s20 + $0x38] sm:$0xff]  ;;  %v473_v2 = vld [vmem:[%s194_s20 + $0x30] sm:$0xff]  ;;  %v472_v3 = vld [vmem:[%s194_s20 + $0x28] sm:$0xff]  ;;  %p461_p1 = scmp.ne.s32.totalorder %s644_s15, 1 }
  0x26   : > { %303 = vmatpush.bf16.msra.mxu0 %v474_v1  ;;  %v471_v4 = vld [vmem:[%s194_s20 + $0x20] sm:$0xff]  ;;  %v470_v5 = vld [vmem:[%s194_s20 + $0x18] sm:$0xff]  ;;  %v469_v6 = vld [vmem:[%s194_s20 + $0x10] sm:$0xff] }
  0x27   : > { %v468_v7 = vld [vmem:[%s194_s20 + $0x8] sm:$0xff]  ;;  %v467_v8 = vld [vmem:[%s194_s20] sm:$0xff]  ;;  %v539_v11 = vld [vmem:[%s226_s26] ss:$0 sm:$0xff] }
  0x2a   : > { %304 = vmatpush.bf16.msra.mxu0 %v473_v2 }
  0x2b   : > { %v233_v9 = vld [vmem:[#allocation2] sm:$0xff] }
  0x2c   : > { %v234_v10 = vpack.c.bf16 %v233_v9, %v233_v9 }
  0x2e   : > { %305 = vmatpush.bf16.msra.mxu0 %v472_v3 }
  0x32   : > { %306 = vmatpush.bf16.msra.mxu0 %v471_v4 }
  0x36   : > { %307 = vmatpush.bf16.msra.mxu0 %v470_v5 }
  0x3a   : > { %308 = vmatpush.bf16.msra.mxu0 %v469_v6 }
  0x3e   : > { %309 = vmatpush.bf16.msra.mxu0 %v468_v7 }
  0x42   : > { %310 = vmatpush.bf16.msra.mxu0 %v467_v8 }
  0x45   : > { %311 = vmatmul.bf16.vlgmr.msra.gmra.mxu0 %v234_v10 }
  0xc2   : > { %v312_v12 = vpop.f32.mrf.mxu0 }
  0xc3   : > { %v313_v13 = vadd.f32 %v539_v11, %v312_v12 }
  0xc5   : > { %v316_v14 = vmax.f32 %v313_v13, 0.0 }
  0xc6   : > { %321 = sbr.rel (%p461_p1) target bundleno = 204 (0xcc), region = 44 }
  0xc7   : > { %317 = vst [vmem:[#allocation2] sm:$0xff] %v316_v14 }
  0xca   : > { %v314_v15 = vpop.f32.mrf.mxu0 }
  0xcb   : > { %322 = vst [vmem:[#allocation6] sm:$0xff] %v316_v14 }
  0xcc PF: > { %p486_p2 = scmp.eq.s32.totalorder %s419_s18, 1  ;;  %s333_s30 = sshll.u32 %s780_s3, 4  ;;  %s334_s30 = int_to_ptr.hbm [resolvable:$true] %s333_s30 }
  0xcd   : > { %s656_s4 = smov [#allocation6]  }
  0xce   : > { %s331_s5 = sshll.u32 %s656_s4, 4  ;;  %s332_s5 = int_to_ptr.vmem [resolvable:$true] %s331_s5 }
  0xcf   : > { %478 = dma.vmem_to_hbm [thread:$0]  (%p486_p2), %s332_s5, 128, %s334_s30, [#allocation5]  }
  0xd0   : > { %627 = dma.done.wait (%p486_p2), [#allocation5], 128  }
  0xd1   : > { %629 = vsyncadd (%p486_p2), [#allocation5], 4294967168 }
  0xd2 PF: > { %s17_s17 = sadd.s32 1, %s652_s17   ;;  %s783_s12 = smov %s636_s13 }
  0xd3   : > { %p14_p3 = scmp.ge.s32.totalorder %s17_s17, 4   ;;  %s784_s13 = smov %s640_s14 }
  0xd4   : > { %s785_s14 = smov %s728_s24  ;;  %s786_s15 = smov %s648_s16 }
  0xd5   : > { %s787_s16 = smov %s789_s19  ;;  %16 = sbr.rel (!%p14_p3) target bundleno = 5 (0x5), region = 84 }
  0xda   :  { %347 = vsyncpa [#allocation4], 1 }
  0xdb   :  { %349 = vsyncpa [#allocation4 + $0x1], 1 }
  0xdc   :  { %350 = vsyncpa [#allocation5], 1 }
  0xdd   :  { %352 = vsyncpa [#allocation5 + $0x1], 1 }

</bundles_post_ra>
